<compile_context>
chip_gen: v7x
topology: tpu7x:2x2x1
jax: 0.10.0
libtpu: 0.0.40
codegen_flags: <defaults>
</compile_context>

<pallas_src>
import jax
import jax.numpy as jnp
from jax.experimental import pallas as pl
from jax.experimental.pallas import tpu as pltpu

_MAX_ROWS_PER_TILE = 512   # (512, 1024) f32 tile: 5 f32 streams + 2 bool streams,
                           # double-buffered ~= 22 MiB VMEM -> fits v5e/v6e/v7x.
_SINGLE_TILE_BYTES = 512 * 1024  # below this, one grid step is fine (per-stream)


def _elementwise_kernel(x_ref, add_ref, sub_ref, mul_ref, div_ref, lt_ref, gt_ref):
    x = x_ref[...]
    add_ref[...] = x + 2.0
    sub_ref[...] = x - 1.0
    mul_ref[...] = x * 3.0
    div_ref[...] = x * 0.5           # == x / 2 exactly (0.5 is representable)
    lt_ref[...] = x < 1.0
    gt_ref[...] = x > 1.0


def _choose_lanes(total):
    """Widest lane count (multiple of 128) that divides `total` -> no padding."""
    for lanes in (1024, 512, 256, 128):
        if total % lanes == 0:
            return lanes, 0
    # Rare ragged case: keep correctness via a small pad at 128 lanes.
    lanes = 128
    return lanes, (-total) % lanes


def pt_module_forward(x):
    """Reproduces PtModule.forward: (x+2, x-1, x*3, x/2, x<1, x>1)."""
    orig_shape = x.shape
    dtype = x.dtype
    total = x.size

    lanes, pad = _choose_lanes(total)
    x_flat = x.reshape(-1)
    if pad:
        x_flat = jnp.pad(x_flat, (0, pad))
    rows = x_flat.size // lanes
    x2d = x_flat.reshape(rows, lanes)

    # Row tile selection:
    #  - tiny inputs (<~512 KiB): single tile, no pipelining needed.
    #  - otherwise aim for >= 4 grid steps (engages DMA double-buffering and
    #    gives v7x's second TensorCore work), tm a multiple of 32 so the
    #    packed bool/int8 (32, 128) sublane tile stays aligned, capped at
    #    512 rows so the footprint fits v7x's 64 MiB per-TC VMEM.
    row_bytes = lanes * jnp.dtype(dtype).itemsize
    if rows * row_bytes <= _SINGLE_TILE_BYTES:
        tm = rows
    else:
        tm = min(_MAX_ROWS_PER_TILE, max(32, 32 * pl.cdiv(pl.cdiv(rows, 4), 32)))
    grid = (pl.cdiv(rows, tm),)

    spec = pl.BlockSpec((tm, lanes), lambda i: (i, 0))
    out_shapes = (
        jax.ShapeDtypeStruct((rows, lanes), dtype),      # added
        jax.ShapeDtypeStruct((rows, lanes), dtype),      # subtracted
        jax.ShapeDtypeStruct((rows, lanes), dtype),      # multiplied
        jax.ShapeDtypeStruct((rows, lanes), dtype),      # divided
        jax.ShapeDtypeStruct((rows, lanes), jnp.bool_),  # less_than
        jax.ShapeDtypeStruct((rows, lanes), jnp.bool_),  # greater_than
    )

    outs = pl.pallas_call(
        _elementwise_kernel,
        out_shape=out_shapes,
        grid=grid,
        in_specs=[spec],
        out_specs=tuple(spec for _ in out_shapes),
        compiler_params=pltpu.CompilerParams(
            # independent tiles -> shard grid steps across v7x's two TCs;
            # harmless no-op on single-TC v5e/v6e.
            dimension_semantics=("parallel",),
            # Actual footprint ~22 MiB double-buffered; 32 MiB covers all
            # generations (v5e default scoped limit of 16 MiB is too small)
            # while leaving headroom on v7x's 64 MiB per-TC VMEM.
            vmem_limit_bytes=32 * 1024 * 1024,
        ),
        # HBM-bound hint: 4 B in + 4*4 B f32 out + 2*1 B bool out = 22 B/elem.
        cost_estimate=pl.CostEstimate(
            flops=6 * total, bytes_accessed=22 * total, transcendentals=0
        ),
    )(x2d)

    def unflatten(a):
        a = a.reshape(-1)
        if pad:
            a = a[:total]
        return a.reshape(orig_shape)

    return tuple(unflatten(a) for a in outs)


if __name__ == "__main__":
    key = jax.random.PRNGKey(0)
    x = jax.random.normal(key, (2, 4, 16, 16), dtype=jnp.float32)

    outs = pt_module_forward(x)
    outs = jax.block_until_ready(outs)

    added, subtracted, multiplied, divided, less_than, greater_than = outs

    # Reference check in plain JAX.
    assert jnp.allclose(added, x + 2)
    assert jnp.allclose(subtracted, x - 1)
    assert jnp.allclose(multiplied, x * 3)
    assert jnp.allclose(divided, x / 2)
    assert jnp.array_equal(less_than, x < 1)
    assert jnp.array_equal(greater_than, x > 1)
    assert less_than.dtype == jnp.bool_ and greater_than.dtype == jnp.bool_
    assert added.shape == x.shape and less_than.shape == x.shape

    print("KERNEL_OK")
</pallas_src>

<mosaic_0001>
module attributes {stable_mosaic.version = 11 : i64} {
  func.func @_elementwise_kernel(%arg0: i32, %arg1: memref<2x1024xf32, #tpu.memory_space<vmem>>, %arg2: memref<2x1024xf32, #tpu.memory_space<vmem>>, %arg3: memref<2x1024xf32, #tpu.memory_space<vmem>>, %arg4: memref<2x1024xf32, #tpu.memory_space<vmem>>, %arg5: memref<2x1024xf32, #tpu.memory_space<vmem>>, %arg6: memref<2x1024xi32, #tpu.memory_space<vmem>>, %arg7: memref<2x1024xi32, #tpu.memory_space<vmem>>) attributes {dimension_semantics = [#tpu.dimension_semantics<parallel>], iteration_bounds = array<i64: 1>, scalar_prefetch = 0 : i64, scratch_operands = 0 : i64, tpu.core_type = #tpu.core_type<tc>, window_params = [{transform_indices = @transform_0, window_bounds = array<i64: 2, 1024>}, {transform_indices = @transform_1, window_bounds = array<i64: 2, 1024>}, {transform_indices = @transform_2, window_bounds = array<i64: 2, 1024>}, {transform_indices = @transform_3, window_bounds = array<i64: 2, 1024>}, {transform_indices = @transform_4, window_bounds = array<i64: 2, 1024>}, {transform_indices = @transform_5, window_bounds = array<i64: 2, 1024>}, {transform_indices = @transform_6, window_bounds = array<i64: 2, 1024>}]} {
    %c0 = arith.constant 0 : index
    %c0_0 = arith.constant 0 : index
    %0 = vector.load %arg1[%c0, %c0_0] : memref<2x1024xf32, #tpu.memory_space<vmem>>, vector<2x1024xf32>
    %cst = arith.constant 2.000000e+00 : f32
    %1 = vector.broadcast %cst : f32 to vector<2x1024xf32>
    %2 = arith.addf %0, %1 : vector<2x1024xf32>
    %c0_1 = arith.constant 0 : index
    %c0_2 = arith.constant 0 : index
    %3 = vector.load %arg2[%c0_1, %c0_2] : memref<2x1024xf32, #tpu.memory_space<vmem>>, vector<2x1024xf32>
    tpu.vector_store %arg2[%c0_1, %c0_2], %2 {strides = array<i32>} : memref<2x1024xf32, #tpu.memory_space<vmem>>, vector<2x1024xf32>,
    %cst_3 = arith.constant 1.000000e+00 : f32
    %4 = vector.broadcast %cst_3 : f32 to vector<2x1024xf32>
    %5 = arith.subf %0, %4 : vector<2x1024xf32>
    %c0_4 = arith.constant 0 : index
    %c0_5 = arith.constant 0 : index
    %6 = vector.load %arg3[%c0_4, %c0_5] : memref<2x1024xf32, #tpu.memory_space<vmem>>, vector<2x1024xf32>
    tpu.vector_store %arg3[%c0_4, %c0_5], %5 {strides = array<i32>} : memref<2x1024xf32, #tpu.memory_space<vmem>>, vector<2x1024xf32>,
    %cst_6 = arith.constant 3.000000e+00 : f32
    %7 = vector.broadcast %cst_6 : f32 to vector<2x1024xf32>
    %8 = arith.mulf %0, %7 : vector<2x1024xf32>
    %c0_7 = arith.constant 0 : index
    %c0_8 = arith.constant 0 : index
    %9 = vector.load %arg4[%c0_7, %c0_8] : memref<2x1024xf32, #tpu.memory_space<vmem>>, vector<2x1024xf32>
    tpu.vector_store %arg4[%c0_7, %c0_8], %8 {strides = array<i32>} : memref<2x1024xf32, #tpu.memory_space<vmem>>, vector<2x1024xf32>,
    %cst_9 = arith.constant 5.000000e-01 : f32
    %10 = vector.broadcast %cst_9 : f32 to vector<2x1024xf32>
    %11 = arith.mulf %0, %10 : vector<2x1024xf32>
    %c0_10 = arith.constant 0 : index
    %c0_11 = arith.constant 0 : index
    %12 = vector.load %arg5[%c0_10, %c0_11] : memref<2x1024xf32, #tpu.memory_space<vmem>>, vector<2x1024xf32>
    tpu.vector_store %arg5[%c0_10, %c0_11], %11 {strides = array<i32>} : memref<2x1024xf32, #tpu.memory_space<vmem>>, vector<2x1024xf32>,
    %cst_12 = arith.constant 1.000000e+00 : f32
    %13 = vector.broadcast %cst_12 : f32 to vector<2x1024xf32>
    %14 = arith.cmpf olt, %0, %13 : vector<2x1024xf32>
    %c0_13 = arith.constant 0 : index
    %c0_14 = arith.constant 0 : index
    %15 = vector.load %arg6[%c0_13, %c0_14] : memref<2x1024xi32, #tpu.memory_space<vmem>>, vector<2x1024xi32>
    %16 = arith.extui %14 : vector<2x1024xi1> to vector<2x1024xi32>
    %cst_15 = arith.constant dense<0> : vector<2x1024xi32>
    %17 = arith.cmpi ne, %15, %cst_15 : vector<2x1024xi32>
    tpu.vector_store %arg6[%c0_13, %c0_14], %16 {strides = array<i32>} : memref<2x1024xi32, #tpu.memory_space<vmem>>, vector<2x1024xi32>,
    %cst_16 = arith.constant 1.000000e+00 : f32
    %18 = vector.broadcast %cst_16 : f32 to vector<2x1024xf32>
    %19 = arith.cmpf ogt, %0, %18 : vector<2x1024xf32>
    %c0_17 = arith.constant 0 : index
    %c0_18 = arith.constant 0 : index
    %20 = vector.load %arg7[%c0_17, %c0_18] : memref<2x1024xi32, #tpu.memory_space<vmem>>, vector<2x1024xi32>
    %21 = arith.extui %19 : vector<2x1024xi1> to vector<2x1024xi32>
    %cst_19 = arith.constant dense<0> : vector<2x1024xi32>
    %22 = arith.cmpi ne, %20, %cst_19 : vector<2x1024xi32>
    tpu.vector_store %arg7[%c0_17, %c0_18], %21 {strides = array<i32>} : memref<2x1024xi32, #tpu.memory_space<vmem>>, vector<2x1024xi32>,
    return
  }
  func.func @transform_0(%arg0: i32) -> (i32, i32) {
    %c0_i32 = arith.constant 0 : i32
    %c0_i32_0 = arith.constant 0 : i32
    return %arg0, %c0_i32 : i32, i32
  }
  func.func @transform_1(%arg0: i32) -> (i32, i32) {
    %c0_i32 = arith.constant 0 : i32
    %c0_i32_0 = arith.constant 0 : i32
    return %arg0, %c0_i32 : i32, i32
  }
  func.func @transform_2(%arg0: i32) -> (i32, i32) {
    %c0_i32 = arith.constant 0 : i32
    %c0_i32_0 = arith.constant 0 : i32
    return %arg0, %c0_i32 : i32, i32
  }
  func.func @transform_3(%arg0: i32) -> (i32, i32) {
    %c0_i32 = arith.constant 0 : i32
    %c0_i32_0 = arith.constant 0 : i32
    return %arg0, %c0_i32 : i32, i32
  }
  func.func @transform_4(%arg0: i32) -> (i32, i32) {
    %c0_i32 = arith.constant 0 : i32
    %c0_i32_0 = arith.constant 0 : i32
    return %arg0, %c0_i32 : i32, i32
  }
  func.func @transform_5(%arg0: i32) -> (i32, i32) {
    %c0_i32 = arith.constant 0 : i32
    %c0_i32_0 = arith.constant 0 : i32
    return %arg0, %c0_i32 : i32, i32
  }
  func.func @transform_6(%arg0: i32) -> (i32, i32) {
    %c0_i32 = arith.constant 0 : i32
    %c0_i32_0 = arith.constant 0 : i32
    return %arg0, %c0_i32 : i32, i32
  }
}

</mosaic_0001>

<bundles_post_ra>
// kernel: tpu_custom_call.1
= control target key start
LH: loop header
LB: loop body
LE: loop exit
PB: predicated region body
PF: predicated region fallthrough
CT: control target
= control target key end

     0   :  { %12 = vsyncpa [#allocation3], 0  ;;  %s394_s0 = inlined_call_operand.hbm [shape: f32[2,1024], index: 0, kind: input, shape index: {}]   ;;  %s395_s1 = inlined_call_operand.hbm [shape: f32[2,1024], index: 1, kind: output, shape index: {0}]   ;;  %s396_s2 = inlined_call_operand.hbm [shape: f32[2,1024], index: 2, kind: output, shape index: {1}]   ;;  %s397_s3 = inlined_call_operand.hbm [shape: f32[2,1024], index: 3, kind: output, shape index: {2}]   ;;  %s398_s4 = inlined_call_operand.hbm [shape: f32[2,1024], index: 4, kind: output, shape index: {3}]   ;;  %s399_s5 = inlined_call_operand.vmem [shape: s32[2,1024], index: 5, kind: output, shape index: {4}]   ;;  %s400_s6 = inlined_call_operand.vmem [shape: s32[2,1024], index: 6, kind: output, shape index: {5}]  }
   0x1   :  { %13 = vsyncpa [#allocation4], 0 }
   0x2   :  { %14 = vsyncpa [#allocation7], 0 }
   0x3   :  { %15 = vsyncpa [#allocation10], 0  ;;  %s249_s21 = smov [#allocation2]   ;;  %s131_s25 = scalar_lea.hbm %s394_s0, 256 }
   0x4   :  { %s22_s22 = sshll.u32 %s249_s21, 4  ;;  %p132_p0 = scmp.ne.s32.totalorder %s394_s0, %s131_s25  ;;  %s23_s22 = int_to_ptr.vmem [resolvable:$true] %s22_s22 }
   0x5   :  { %p135_p1 = scmp.lt.u32.totalorder %s131_s25, %s394_s0 }
   0x7   :  { %p137_p2 = pnand %p135_p1, %p132_p0 }
   0x9   :  { %140 = shalt.err (!%p137_p2)
}
   0xa   :  { %s141_s30 = scalar_lea.vmem %s23_s22, 256  ;;  %p146_p4 = scmp.lt.s32.totalorder %s23_s22, %s23_s22 }
   0xb   :  { %p142_p3 = scmp.ne.s32.totalorder %s23_s22, %s141_s30  ;;  %p147_p5 = scmp.lt.s32.totalorder %s141_s30, %s141_s30 }
   0xd   :  { %p148_p6 = por %p147_p5, %p146_p4 }
   0xf   :  { %p149_p7 = pnand %p148_p6, %p142_p3 }
  0x11   :  { %152 = shalt.err (!%p149_p7)
}
  0x12   :  { %25 = dma.hbm_to_vmem [thread:$0]  %s394_s0, 256, %s23_s22, [#allocation3]  }
  0x13   :  { %241 = dma.done.wait [#allocation3], 256  }
  0x14   :  { %242 = vsyncadd [#allocation3], 4294967040  ;;  %s250_s9 = smov [#allocation6]   ;;  %s251_s11 = smov [#allocation5]   ;;  %v29_v0 = vld [vmem:[#allocation2] sm:$0xff]  ;;  %v30_v1 = vld [vmem:[#allocation2 + $0x8] sm:$0xff] }
  0x15   :  { %s75_s10 = sshll.u32 %s250_s9, 4  ;;  %s65_s12 = sshll.u32 %s251_s11, 4  ;;  %v123_v2 = vadd.f32 -1.0, %v29_v0  ;;  %v124_v3 = vadd.f32 -1.0, %v30_v1  ;;  %v31_v4 = vadd.f32 2.0, %v29_v0  ;;  %v32_v5 = vadd.f32 2.0, %v30_v1  ;;  %s302_s10 = int_to_ptr.vmem [resolvable:$true] %s75_s10  ;;  %s304_s12 = int_to_ptr.vmem [resolvable:$true] %s65_s12 }
  0x16   :  { %s252_s13 = smov [#allocation8]   ;;  %s253_s15 = smov [#allocation9]   ;;  %v39_v6 = vmul.f32 3.0, %v29_v0  ;;  %v40_v7 = vmul.f32 3.0, %v30_v1  ;;  %v43_v8 = vmul.f32 0.5, %v29_v0  ;;  %v44_v9 = vmul.f32 0.5, %v30_v1 }
  0x17   :  { %s85_s14 = sshll.u32 %s252_s13, 4  ;;  %s95_s16 = sshll.u32 %s253_s15, 4  ;;  %37 = vst [vmem:[#allocation6] sm:$0xff] %v123_v2  ;;  %38 = vst [vmem:[#allocation6 + $0x8] sm:$0xff] %v124_v3  ;;  %vm47_vm0 = vcmp.lt.f32.partialorder %v29_v0, 1.0  ;;  %vm48_vm1 = vcmp.lt.f32.partialorder %v30_v1, 1.0  ;;  %s306_s14 = int_to_ptr.vmem [resolvable:$true] %s85_s14  ;;  %s308_s16 = int_to_ptr.vmem [resolvable:$true] %s95_s16 }
  0x18   :  { %33 = vst [vmem:[#allocation5] sm:$0xff] %v31_v4  ;;  %34 = vst [vmem:[#allocation5 + $0x8] sm:$0xff] %v32_v5  ;;  %vm53_vm2 = vcmp.gt.f32.partialorder %v29_v0, 1.0  ;;  %vm54_vm3 = vcmp.gt.f32.partialorder %v30_v1, 1.0  ;;  %s153_s0 = scalar_lea.vmem %s302_s10, 256  ;;  %p158_p9 = scmp.lt.s32.totalorder %s302_s10, %s302_s10 }
  0x19   :  { %41 = vst [vmem:[#allocation8] sm:$0xff] %v39_v6  ;;  %42 = vst [vmem:[#allocation8 + $0x8] sm:$0xff] %v40_v7  ;;  %p154_p8 = scmp.ne.s32.totalorder %s302_s10, %s153_s0  ;;  %p159_p10 = scmp.lt.s32.totalorder %s153_s0, %s153_s0 }
  0x1a   :  { %45 = vst [vmem:[#allocation9] sm:$0xff] %v43_v8  ;;  %46 = vst [vmem:[#allocation9 + $0x8] sm:$0xff] %v44_v9 }
  0x1b   :  { %p160_p11 = por %p159_p10, %p158_p9 }
  0x1d   :  { %p161_p12 = pnand %p160_p11, %p154_p8 }
  0x1f   :  { %164 = shalt.err (!%p161_p12)
}
  0x20   :  { %s165_s19 = scalar_lea.hbm %s396_s2, 256 }
  0x21   :  { %p166_p13 = scmp.ne.s32.totalorder %s396_s2, %s165_s19  ;;  %p169_p0 = scmp.lt.u32.totalorder %s165_s19, %s396_s2 }
  0x23   :  { %p171_p1 = pnand %p169_p0, %p166_p13 }
  0x25   :  { %174 = shalt.err (!%p171_p1)
}
  0x26   :  { %78 = dma.vmem_to_hbm [thread:$0]  %s302_s10, 256, %s396_s2, [#allocation7]   ;;  %v254_v10 = vmov 0  }
  0x27   :  { %v49_v11 = vsel %vm47_vm0, 1, %v254_v10  ;;  %v50_v12 = vsel %vm48_vm1, 1, %v254_v10  ;;  %v55_v13 = vsel %vm53_vm2, 1, %v254_v10  ;;  %v56_v14 = vsel %vm54_vm3, 1, %v254_v10  ;;  %s175_s9 = scalar_lea.vmem %s304_s12, 256  ;;  %p180_p3 = scmp.lt.s32.totalorder %s304_s12, %s304_s12 }
  0x28   :  { %51 = vst [vmem:[%s399_s5] sm:$0xff] %v49_v11  ;;  %52 = vst [vmem:[%s399_s5 + $0x8] sm:$0xff] %v50_v12  ;;  %p176_p2 = scmp.ne.s32.totalorder %s304_s12, %s175_s9  ;;  %p181_p4 = scmp.lt.s32.totalorder %s175_s9, %s175_s9 }
  0x29   :  { %57 = vst [vmem:[%s400_s6] sm:$0xff] %v55_v13  ;;  %58 = vst [vmem:[%s400_s6 + $0x8] sm:$0xff] %v56_v14 }
  0x2a   :  { %p182_p5 = por %p181_p4, %p180_p3 }
  0x2c   :  { %p183_p6 = pnand %p182_p5, %p176_p2 }
  0x2e   :  { %186 = shalt.err (!%p183_p6)
}
  0x2f   :  { %s187_s5 = scalar_lea.hbm %s395_s1, 256 }
  0x30   :  { %p188_p7 = scmp.ne.s32.totalorder %s395_s1, %s187_s5  ;;  %p191_p8 = scmp.lt.u32.totalorder %s187_s5, %s395_s1 }
  0x32   :  { %p193_p9 = pnand %p191_p8, %p188_p7 }
  0x34   :  { %196 = shalt.err (!%p193_p9)
}
  0x35   :  { %68 = dma.vmem_to_hbm [thread:$0]  %s304_s12, 256, %s395_s1, [#allocation4]  }
  0x36   :  { %s197_s19 = scalar_lea.vmem %s306_s14, 256  ;;  %p202_p11 = scmp.lt.s32.totalorder %s306_s14, %s306_s14 }
  0x37   :  { %p198_p10 = scmp.ne.s32.totalorder %s306_s14, %s197_s19  ;;  %p203_p12 = scmp.lt.s32.totalorder %s197_s19, %s197_s19 }
  0x39   :  { %p204_p13 = por %p203_p12, %p202_p11 }
  0x3b   :  { %p205_p0 = pnand %p204_p13, %p198_p10 }
  0x3d   :  { %208 = shalt.err (!%p205_p0)
}
  0x3e   :  { %s209_s22 = scalar_lea.hbm %s397_s3, 256 }
  0x3f   :  { %p210_p1 = scmp.ne.s32.totalorder %s397_s3, %s209_s22  ;;  %p213_p2 = scmp.lt.u32.totalorder %s209_s22, %s397_s3 }
  0x41   :  { %p215_p3 = pnand %p213_p2, %p210_p1 }
  0x43   :  { %218 = shalt.err (!%p215_p3)
}
  0x44   :  { %88 = dma.vmem_to_hbm [thread:$0]  %s306_s14, 256, %s397_s3, [#allocation7]  }
  0x45   :  { %s219_s27 = scalar_lea.vmem %s308_s16, 256  ;;  %p224_p5 = scmp.lt.s32.totalorder %s308_s16, %s308_s16 }
  0x46   :  { %p220_p4 = scmp.ne.s32.totalorder %s308_s16, %s219_s27  ;;  %p225_p6 = scmp.lt.s32.totalorder %s219_s27, %s219_s27 }
  0x48   :  { %p226_p7 = por %p225_p6, %p224_p5 }
  0x4a   :  { %p227_p8 = pnand %p226_p7, %p220_p4 }
  0x4c   :  { %230 = shalt.err (!%p227_p8)
}
  0x4d   :  { %s231_s30 = scalar_lea.hbm %s398_s4, 256 }
  0x4e   :  { %p232_p9 = scmp.ne.s32.totalorder %s398_s4, %s231_s30  ;;  %p235_p10 = scmp.lt.u32.totalorder %s231_s30, %s398_s4 }
  0x50   :  { %p237_p11 = pnand %p235_p10, %p232_p9 }
  0x52   :  { %240 = shalt.err (!%p237_p11)
}
  0x53   :  { %98 = dma.vmem_to_hbm [thread:$0]  %s308_s16, 256, %s398_s4, [#allocation10]  }
  0x54   :  { %243 = dma.done.wait [#allocation4], 256  }
  0x55   :  { %244 = vsyncadd [#allocation4], 4294967040 }
  0x56   :  { %245 = dma.done.wait [#allocation7], 512  }
  0x57   :  { %246 = vsyncadd [#allocation7], 4294966784 }
  0x58   :  { %247 = dma.done.wait [#allocation10], 256  }
  0x59   :  { %248 = vsyncadd [#allocation10], 4294967040 }
  0x5a   :  { %119 = vsyncpa [#allocation3], 1 }
  0x5b   :  { %120 = vsyncpa [#allocation4], 1 }
  0x5c   :  { %121 = vsyncpa [#allocation7], 1 }
  0x5d   :  { %122 = vsyncpa [#allocation10], 1 }

</bundles_post_ra>
